<compile_context>
chip_gen: v5e
topology: v5e:2x2
jax: 0.10.0
libtpu: 0.0.40
codegen_flags: <defaults>
</compile_context>

<pallas_src>
import jax
import jax.numpy as jnp
import numpy as np
from jax.experimental import pallas as pl
from jax.experimental.pallas import tpu as pltpu

_LANE = 128
_SUBLANE = 8
_NTERMS = 7   # [mse_num, night_num, night_cnt, nonpv_num, nonpv_cnt, peak_num, peak_cnt]

_TARGET_TILE_BYTES = 512 * 1024   # per input stream, per pipeline buffer
_MAX_TILE_ROWS = 256


def _round_up(x, m):
    return (x + m - 1) // m * m


def _loss_tile_kernel(out_ref, tgt_ref, pod_ref, pv_ref, o_ref):
    """One (TB, T_pad) batch tile of the loss partial sums.

    o_ref block layout: (1, 7*8, 128) f32; rows [k*8:(k+1)*8] hold the
    (8, 128)-folded partial sum of term k:
      0: sum((out - tgt)^2)
      1: sum(relu(-out) * night_mask)        2: sum(night_mask)
      3: sum(-out * nonpv_neg_mask)          4: sum(nonpv_neg_mask)
      5: sum((out - tgt)^2 * peak_mask)      6: sum(peak_mask)
    """
    tb, t_pad = out_ref.shape

    out = out_ref[...]
    tgt = tgt_ref[...]
    pod = pod_ref[...]

    neg_out = -out                     # reused by the night and non-PV terms
    diff = out - tgt
    sq = diff * diff

    night = pod == 0.0                                   # (tb, t_pad) bool
    peak = jnp.logical_or(pod == 0.25, pod == 1.0)       # (tb, t_pad) bool
    # is_pv is a per-series (tb, 1) column; broadcast it against the
    # per-element negativity mask inside the kernel.
    nonpv = jnp.logical_and(pv_ref[...] == 0.0, out < 0.0)

    zero = jnp.zeros_like(out)         # hoisted broadcasts (JAX does not CSE them)
    one = jnp.ones_like(out)

    def fold_and_store(k, t):
        # (tb, t_pad) -> (8, 128) using only aligned static slices + VPU adds.
        # The cross-lane / cross-sublane reduction is deferred to JAX on the
        # tiny (num_tiles, 7, 8, 128) partials array.
        acc = t[0:_SUBLANE, :]
        for r in range(1, tb // _SUBLANE):
            acc = acc + t[r * _SUBLANE:(r + 1) * _SUBLANE, :]
        folded = acc[:, 0:_LANE]
        for c in range(1, t_pad // _LANE):
            folded = folded + acc[:, c * _LANE:(c + 1) * _LANE]
        o_ref[0, k * _SUBLANE:(k + 1) * _SUBLANE, :] = folded

    fold_and_store(0, sq)                                           # MSE num
    fold_and_store(1, jnp.where(night, jnp.maximum(neg_out, zero), zero))
    fold_and_store(2, jnp.where(night, one, zero))                  # night cnt
    fold_and_store(3, jnp.where(nonpv, neg_out, zero))              # nonpv num
    fold_and_store(4, jnp.where(nonpv, one, zero))                  # nonpv cnt
    fold_and_store(5, jnp.where(peak, sq, zero))                    # peak num
    fold_and_store(6, jnp.where(peak, one, zero))                   # peak cnt


def _partial_sums(out2d, tgt2d, pod2d, pv_col):
    """Returns the 7 global partial sums as a (7,) f32 vector."""
    B, T = out2d.shape
    t_pad = _round_up(T, _LANE)
    b8 = _round_up(B, _SUBLANE)

    # Tile rows: largest multiple of 8 such that one (TB, t_pad) f32 tile is
    # <= ~512 KiB, capped at 256 rows (safe for v5e/v6e/v7x VMEM budgets with
    # double-buffering and full-tile temporaries).
    rows_budget = max(_SUBLANE,
                      (_TARGET_TILE_BYTES // (t_pad * 4)) // _SUBLANE * _SUBLANE)
    tb = min(_MAX_TILE_ROWS, rows_budget, b8)
    b_pad = _round_up(b8, tb)
    nb = b_pad // tb

    # Pad with values that keep every mask False and every product zero:
    #   out = 0, tgt = 0  -> sq = 0, out < 0 is False
    #   pod = 0.5         -> neither night (0.0) nor peak (0.25 / 1.0)
    #   pv  = 1.0         -> not a non-PV series
    def pad2d(x, fill):
        pb, pt = b_pad - x.shape[0], t_pad - x.shape[1]
        if pb or pt:
            x = jnp.pad(x, ((0, pb), (0, pt)), constant_values=fill)
        return x

    def pad_rows(x, fill):
        pb = b_pad - x.shape[0]
        if pb:
            x = jnp.pad(x, ((0, pb), (0, 0)), constant_values=fill)
        return x

    out_p = pad2d(out2d, 0.0)
    tgt_p = pad2d(tgt2d, 0.0)
    pod_p = pad2d(pod2d, 0.5)
    pv_p = pad_rows(pv_col, 1.0)

    cost = pl.CostEstimate(
        flops=16 * b_pad * t_pad,
        transcendentals=0,
        bytes_accessed=3 * b_pad * t_pad * 4 + b_pad * 4
        + nb * _NTERMS * _SUBLANE * _LANE * 4)

    partials = pl.pallas_call(
        _loss_tile_kernel,
        out_shape=jax.ShapeDtypeStruct((nb, _NTERMS * _SUBLANE, _LANE),
                                       jnp.float32),
        grid=(nb,),
        in_specs=[
            pl.BlockSpec((tb, t_pad), lambda i: (i, 0)),
            pl.BlockSpec((tb, t_pad), lambda i: (i, 0)),
            pl.BlockSpec((tb, t_pad), lambda i: (i, 0)),
            pl.BlockSpec((tb, 1), lambda i: (i, 0)),
        ],
        out_specs=pl.BlockSpec((1, _NTERMS * _SUBLANE, _LANE),
                               lambda i: (i, 0, 0)),
        compiler_params=pltpu.CompilerParams(
            dimension_semantics=("parallel",),
            vmem_limit_bytes=32 * 1024 * 1024),
        cost_estimate=cost,
    )(out_p, tgt_p, pod_p, pv_p)

    # Final (tiny) cross-tile / cross-lane / cross-sublane reduction in JAX.
    sums = jnp.sum(partials.reshape(nb, _NTERMS, _SUBLANE, _LANE),
                   axis=(0, 2, 3))
    return sums


def custom_loss_forward(output, target, feature_mappings, weights):
    """Mirrors CustomLoss.forward.

    output:  (B, T, 1)
    target:  tuple(future_covariates (B, T, Cf),
                   static_covariates (B, 1, Cs),
                   real_target       (B, T, 1))
    Returns [sum_, loss, night_pen, nonpv_pen, peaks_pen, airco_pen].
    """
    real_target = target[-1]
    B, T = output.shape[0], output.shape[1]

    out2d = output.reshape(B, T).astype(jnp.float32)
    tgt2d = real_target.reshape(B, T).astype(jnp.float32)

    pod_idx, pod_pos = feature_mappings['future_part_of_day']
    pod2d = target[pod_idx][:, :, pod_pos].astype(jnp.float32)        # (B, T)

    pv_idx, pv_pos = feature_mappings['is_pv']
    pv_col = target[pv_idx][:, :, pv_pos].reshape(B, 1).astype(jnp.float32)

    s = _partial_sums(out2d, tgt2d, pod2d, pv_col)

    n_elem = jnp.float32(B * T)
    loss = s[0] / n_elem

    zero = jnp.float32(0.0)
    penalty_night = zero
    penalty_nonpv = zero
    penalty_peaks = zero
    penalty_airco = zero

    # NOTE: weights is a config-time dict of Python numbers (as in the torch
    # module); these are Python-level branches, not traced conditionals.
    if weights['no_neg_pred_night'] > 0:
        # mean over an empty night selection -> NaN, matching torch.mean([]).
        penalty_night = (s[1] / s[2]) * weights['no_neg_pred_night']
    if weights['no_neg_pred_nonpv'] > 0:
        # torch returns 0 when there are no negative non-PV predictions.
        penalty_nonpv = jnp.where(s[4] == 0.0, 0.0,
                                  s[3] / jnp.maximum(s[4], 1.0)) \
            * weights['no_neg_pred_nonpv']
    if weights['morning_evening_peaks'] > 0:
        penalty_peaks = (s[5] / s[6]) * weights['morning_evening_peaks']
    if weights['air_co'] > 0:
        # _get_loss_for_airco_usage always returns 0 in the reference.
        penalty_airco = zero * weights['air_co']

    sum_ = loss + penalty_night + penalty_nonpv + penalty_peaks + penalty_airco
    return [sum_, loss, penalty_night, penalty_nonpv, penalty_peaks,
            penalty_airco]


def _reference_loss(output, target, feature_mappings, weights):
    """Pure-JAX eager reference using boolean-mask gathers (torch semantics)."""
    real_target = target[-1]
    out = output[..., 0]
    tgt = real_target[..., 0]

    pod_idx, pod_pos = feature_mappings['future_part_of_day']
    pod = target[pod_idx][:, :, pod_pos]
    pv_idx, pv_pos = feature_mappings['is_pv']
    pv = target[pv_idx][:, :, pv_pos].reshape(-1)

    loss = jnp.mean((out - tgt) ** 2)

    zero = jnp.float32(0.0)
    pen_night = zero
    pen_nonpv = zero
    pen_peaks = zero
    pen_airco = zero

    if weights['no_neg_pred_night'] > 0:
        pen_night = jnp.mean(jax.nn.relu(-out[pod == 0.0])) \
            * weights['no_neg_pred_night']
    if weights['no_neg_pred_nonpv'] > 0:
        nonpv_rows = out[pv == 0.0]
        neg = nonpv_rows[nonpv_rows < 0.0]
        pen = zero if neg.size == 0 else jnp.mean(-neg)
        pen_nonpv = pen * weights['no_neg_pred_nonpv']
    if weights['morning_evening_peaks'] > 0:
        peak_mask = (pod == 0.25) | (pod == 1.0)
        pen_peaks = jnp.mean((out[peak_mask] - tgt[peak_mask]) ** 2) \
            * weights['morning_evening_peaks']
    if weights['air_co'] > 0:
        pen_airco = zero * weights['air_co']

    sum_ = loss + pen_night + pen_nonpv + pen_peaks + pen_airco
    return [sum_, loss, pen_night, pen_nonpv, pen_peaks, pen_airco]


if __name__ == "__main__":
    key = jax.random.PRNGKey(0)
    k_out, k_tgt, k_pod, k_pv, k_fut = jax.random.split(key, 5)

    # Deliberately NOT multiples of (8, 128) to exercise the padding path.
    B, T = 6, 96           # batch, output_chunk_length
    Cf, Cs = 3, 2          # future / static covariate channels

    # model output and real target (normal -> contains negatives)
    output = jax.random.normal(k_out, (B, T, 1), dtype=jnp.float32)
    real_target = jax.random.normal(k_tgt, (B, T, 1), dtype=jnp.float32)

    # future covariates: part_of_day in {0.0, 0.25, 0.5, 0.75, 1.0} at pos 1
    part_of_day = (jax.random.randint(k_pod, (B, T), 0, 5)
                   .astype(jnp.float32) * 0.25)
    future_cov = jax.random.normal(k_fut, (B, T, Cf), dtype=jnp.float32)
    future_cov = future_cov.at[:, :, 1].set(part_of_day)

    # static covariates: is_pv (0/1 per series) at pos 0
    is_pv = jax.random.bernoulli(k_pv, 0.5, (B, 1)).astype(jnp.float32)
    static_cov = jnp.zeros((B, 1, Cs), dtype=jnp.float32)
    static_cov = static_cov.at[:, :, 0].set(is_pv)

    target = (future_cov, static_cov, real_target)

    feature_mappings = {'future_part_of_day': (0, 1), 'is_pv': (1, 0)}
    weights = {'no_neg_pred_night': 1.0,
               'no_neg_pred_nonpv': 0.5,
               'morning_evening_peaks': 2.0,
               'air_co': 0.0}

    results = custom_loss_forward(output, target, feature_mappings, weights)
    results = [jax.block_until_ready(r) for r in results]

    ref = _reference_loss(output, target, feature_mappings, weights)
    for got, want in zip(results, ref):
        np.testing.assert_allclose(np.asarray(got), np.asarray(want),
                                   rtol=1e-4, atol=1e-5)

    print("KERNEL_OK")
</pallas_src>

<mosaic_0001>
module attributes {stable_mosaic.version = 11 : i64} {
  func.func @_loss_tile_kernel(%arg0: i32, %arg1: memref<8x128xf32, #tpu.memory_space<vmem>>, %arg2: memref<8x128xf32, #tpu.memory_space<vmem>>, %arg3: memref<8x128xf32, #tpu.memory_space<vmem>>, %arg4: memref<8x1xf32, #tpu.memory_space<vmem>>, %arg5: memref<1x56x128xf32, #tpu.memory_space<vmem>>) attributes {dimension_semantics = [#tpu.dimension_semantics<parallel>], iteration_bounds = array<i64: 1>, scalar_prefetch = 0 : i64, scratch_operands = 0 : i64, tpu.core_type = #tpu.core_type<tc>, window_params = [{transform_indices = @transform_0, window_bounds = array<i64: 8, 128>}, {transform_indices = @transform_1, window_bounds = array<i64: 8, 128>}, {transform_indices = @transform_2, window_bounds = array<i64: 8, 128>}, {transform_indices = @transform_3, window_bounds = array<i64: 8, 1>}, {transform_indices = @transform_4, window_bounds = array<i64: 1, 56, 128>}]} {
    %c0 = arith.constant 0 : index
    %c0_0 = arith.constant 0 : index
    %0 = vector.load %arg1[%c0, %c0_0] : memref<8x128xf32, #tpu.memory_space<vmem>>, vector<8x128xf32>
    %c0_1 = arith.constant 0 : index
    %c0_2 = arith.constant 0 : index
    %1 = vector.load %arg2[%c0_1, %c0_2] : memref<8x128xf32, #tpu.memory_space<vmem>>, vector<8x128xf32>
    %c0_3 = arith.constant 0 : index
    %c0_4 = arith.constant 0 : index
    %2 = vector.load %arg3[%c0_3, %c0_4] : memref<8x128xf32, #tpu.memory_space<vmem>>, vector<8x128xf32>
    %cst = arith.constant 0.000000e+00 : f32
    %3 = vector.broadcast %cst : f32 to vector<8x128xf32>
    %4 = arith.subf %3, %0 : vector<8x128xf32>
    %5 = arith.subf %0, %1 : vector<8x128xf32>
    %6 = arith.mulf %5, %5 : vector<8x128xf32>
    %cst_5 = arith.constant 0.000000e+00 : f32
    %7 = vector.broadcast %cst_5 : f32 to vector<8x128xf32>
    %8 = arith.cmpf oeq, %2, %7 : vector<8x128xf32>
    %cst_6 = arith.constant 2.500000e-01 : f32
    %9 = vector.broadcast %cst_6 : f32 to vector<8x128xf32>
    %10 = arith.cmpf oeq, %2, %9 : vector<8x128xf32>
    %cst_7 = arith.constant 1.000000e+00 : f32
    %11 = vector.broadcast %cst_7 : f32 to vector<8x128xf32>
    %12 = arith.cmpf oeq, %2, %11 : vector<8x128xf32>
    %13 = arith.ori %10, %12 : vector<8x128xi1>
    %c0_8 = arith.constant 0 : index
    %c0_9 = arith.constant 0 : index
    %14 = vector.load %arg4[%c0_8, %c0_9] : memref<8x1xf32, #tpu.memory_space<vmem>>, vector<8x1xf32>
    %cst_10 = arith.constant 0.000000e+00 : f32
    %15 = vector.broadcast %cst_10 : f32 to vector<8x1xf32>
    %16 = arith.cmpf oeq, %14, %15 : vector<8x1xf32>
    %cst_11 = arith.constant 0.000000e+00 : f32
    %17 = vector.broadcast %cst_11 : f32 to vector<8x128xf32>
    %18 = arith.cmpf olt, %0, %17 : vector<8x128xf32>
    %19 = vector.broadcast %16 : vector<8x1xi1> to vector<8x128xi1>
    %20 = arith.andi %19, %18 : vector<8x128xi1>
    %cst_12 = arith.constant 0.000000e+00 : f32
    %21 = vector.broadcast %cst_12 : f32 to vector<8x128xf32>
    %cst_13 = arith.constant 1.000000e+00 : f32
    %22 = vector.broadcast %cst_13 : f32 to vector<8x128xf32>
    %c0_14 = arith.constant 0 : index
    %c0_15 = arith.constant 0 : index
    %c0_16 = arith.constant 0 : index
    %23 = vector.load %arg5[%c0_14, %c0_15, %c0_16] : memref<1x56x128xf32, #tpu.memory_space<vmem>>, vector<1x8x128xf32>
    %24 = vector.shape_cast %23 : vector<1x8x128xf32> to vector<8x128xf32>
    %25 = vector.shape_cast %6 : vector<8x128xf32> to vector<1x8x128xf32>
    tpu.vector_store %arg5[%c0_14, %c0_15, %c0_16], %25 {strides = array<i32>} : memref<1x56x128xf32, #tpu.memory_space<vmem>>, vector<1x8x128xf32>,
    %26 = arith.maximumf %4, %21 : vector<8x128xf32>
    %27 = arith.select %8, %26, %21 : vector<8x128xi1>, vector<8x128xf32>
    %c0_17 = arith.constant 0 : index
    %c8 = arith.constant 8 : index
    %c0_18 = arith.constant 0 : index
    %28 = vector.load %arg5[%c0_17, %c8, %c0_18] : memref<1x56x128xf32, #tpu.memory_space<vmem>>, vector<1x8x128xf32>
    %29 = vector.shape_cast %28 : vector<1x8x128xf32> to vector<8x128xf32>
    %30 = vector.shape_cast %27 : vector<8x128xf32> to vector<1x8x128xf32>
    tpu.vector_store %arg5[%c0_17, %c8, %c0_18], %30 {strides = array<i32>} : memref<1x56x128xf32, #tpu.memory_space<vmem>>, vector<1x8x128xf32>,
    %31 = arith.select %8, %22, %21 : vector<8x128xi1>, vector<8x128xf32>
    %c0_19 = arith.constant 0 : index
    %c16 = arith.constant 16 : index
    %c0_20 = arith.constant 0 : index
    %32 = vector.load %arg5[%c0_19, %c16, %c0_20] : memref<1x56x128xf32, #tpu.memory_space<vmem>>, vector<1x8x128xf32>
    %33 = vector.shape_cast %32 : vector<1x8x128xf32> to vector<8x128xf32>
    %34 = vector.shape_cast %31 : vector<8x128xf32> to vector<1x8x128xf32>
    tpu.vector_store %arg5[%c0_19, %c16, %c0_20], %34 {strides = array<i32>} : memref<1x56x128xf32, #tpu.memory_space<vmem>>, vector<1x8x128xf32>,
    %35 = arith.select %20, %4, %21 : vector<8x128xi1>, vector<8x128xf32>
    %c0_21 = arith.constant 0 : index
    %c24 = arith.constant 24 : index
    %c0_22 = arith.constant 0 : index
    %36 = vector.load %arg5[%c0_21, %c24, %c0_22] : memref<1x56x128xf32, #tpu.memory_space<vmem>>, vector<1x8x128xf32>
    %37 = vector.shape_cast %36 : vector<1x8x128xf32> to vector<8x128xf32>
    %38 = vector.shape_cast %35 : vector<8x128xf32> to vector<1x8x128xf32>
    tpu.vector_store %arg5[%c0_21, %c24, %c0_22], %38 {strides = array<i32>} : memref<1x56x128xf32, #tpu.memory_space<vmem>>, vector<1x8x128xf32>,
    %39 = arith.select %20, %22, %21 : vector<8x128xi1>, vector<8x128xf32>
    %c0_23 = arith.constant 0 : index
    %c32 = arith.constant 32 : index
    %c0_24 = arith.constant 0 : index
    %40 = vector.load %arg5[%c0_23, %c32, %c0_24] : memref<1x56x128xf32, #tpu.memory_space<vmem>>, vector<1x8x128xf32>
    %41 = vector.shape_cast %40 : vector<1x8x128xf32> to vector<8x128xf32>
    %42 = vector.shape_cast %39 : vector<8x128xf32> to vector<1x8x128xf32>
    tpu.vector_store %arg5[%c0_23, %c32, %c0_24], %42 {strides = array<i32>} : memref<1x56x128xf32, #tpu.memory_space<vmem>>, vector<1x8x128xf32>,
    %43 = arith.select %13, %6, %21 : vector<8x128xi1>, vector<8x128xf32>
    %c0_25 = arith.constant 0 : index
    %c40 = arith.constant 40 : index
    %c0_26 = arith.constant 0 : index
    %44 = vector.load %arg5[%c0_25, %c40, %c0_26] : memref<1x56x128xf32, #tpu.memory_space<vmem>>, vector<1x8x128xf32>
    %45 = vector.shape_cast %44 : vector<1x8x128xf32> to vector<8x128xf32>
    %46 = vector.shape_cast %43 : vector<8x128xf32> to vector<1x8x128xf32>
    tpu.vector_store %arg5[%c0_25, %c40, %c0_26], %46 {strides = array<i32>} : memref<1x56x128xf32, #tpu.memory_space<vmem>>, vector<1x8x128xf32>,
    %47 = arith.select %13, %22, %21 : vector<8x128xi1>, vector<8x128xf32>
    %c0_27 = arith.constant 0 : index
    %c48 = arith.constant 48 : index
    %c0_28 = arith.constant 0 : index
    %48 = vector.load %arg5[%c0_27, %c48, %c0_28] : memref<1x56x128xf32, #tpu.memory_space<vmem>>, vector<1x8x128xf32>
    %49 = vector.shape_cast %48 : vector<1x8x128xf32> to vector<8x128xf32>
    %50 = vector.shape_cast %47 : vector<8x128xf32> to vector<1x8x128xf32>
    tpu.vector_store %arg5[%c0_27, %c48, %c0_28], %50 {strides = array<i32>} : memref<1x56x128xf32, #tpu.memory_space<vmem>>, vector<1x8x128xf32>,
    return
  }
  func.func @transform_0(%arg0: i32) -> (i32, i32) {
    %c0_i32 = arith.constant 0 : i32
    %c0_i32_0 = arith.constant 0 : i32
    return %arg0, %c0_i32 : i32, i32
  }
  func.func @transform_1(%arg0: i32) -> (i32, i32) {
    %c0_i32 = arith.constant 0 : i32
    %c0_i32_0 = arith.constant 0 : i32
    return %arg0, %c0_i32 : i32, i32
  }
  func.func @transform_2(%arg0: i32) -> (i32, i32) {
    %c0_i32 = arith.constant 0 : i32
    %c0_i32_0 = arith.constant 0 : i32
    return %arg0, %c0_i32 : i32, i32
  }
  func.func @transform_3(%arg0: i32) -> (i32, i32) {
    %c0_i32 = arith.constant 0 : i32
    %c0_i32_0 = arith.constant 0 : i32
    return %arg0, %c0_i32 : i32, i32
  }
  func.func @transform_4(%arg0: i32) -> (i32, i32, i32) {
    %c0_i32 = arith.constant 0 : i32
    %c0_i32_0 = arith.constant 0 : i32
    %c0_i32_1 = arith.constant 0 : i32
    return %arg0, %c0_i32, %c0_i32_0 : i32, i32, i32
  }
}

</mosaic_0001>

<bundles_post_ra>
// kernel: tpu_custom_call.1
= control target key start
LH: loop header
LB: loop body
LE: loop exit
PB: predicated region body
PF: predicated region fallthrough
CT: control target
= control target key end

     0   :  { %9 = vsyncpa [#allocation3], 0  ;;  %s232_s0 = inlined_call_operand.vmem [shape: f32[8,128], index: 0, kind: input, shape index: {}]   ;;  %s233_s1 = inlined_call_operand.hbm [shape: f32[8,128], index: 1, kind: input, shape index: {}]   ;;  %s234_s2 = inlined_call_operand.hbm [shape: f32[8,128], index: 2, kind: input, shape index: {}]   ;;  %s235_s3 = inlined_call_operand.vmem [shape: f32[8,1], index: 3, kind: input, shape index: {}]   ;;  %s236_s4 = inlined_call_operand.hbm [shape: f32[1,56,128], index: 4, kind: output, shape index: {}]  }
   0x1   :  { %10 = vsyncpa [#allocation6], 0 }
   0x2   :  { %11 = vsyncpa [#allocation4], 0  ;;  %s19_s17 = sshll.u32 %s233_s1, 4  ;;  %s185_s18 = smov [#allocation2]   ;;  %s20_s17 = int_to_ptr.hbm [resolvable:$true] %s19_s17 }
   0x3   :  { %s21_s19 = sshll.u32 %s185_s18, 4  ;;  %s30_s22 = sshll.u32 %s234_s2, 4  ;;  %s22_s19 = int_to_ptr.vmem [resolvable:$true] %s21_s19  ;;  %s31_s22 = int_to_ptr.hbm [resolvable:$true] %s30_s22 }
   0x4   :  { %24 = dma.hbm_to_vmem [thread:$0]  %s20_s17, 128, %s22_s19, [#allocation3]  }
   0x5   :  { %s186_s23 = smov [#allocation5]  }
   0x6   :  { %s32_s24 = sshll.u32 %s186_s23, 4  ;;  %s33_s24 = int_to_ptr.vmem [resolvable:$true] %s32_s24 }
   0x7   :  { %35 = dma.hbm_to_vmem [thread:$0]  %s31_s22, 128, %s33_s24, [#allocation6]  }
   0x8   :  { %179 = dma.done.wait [#allocation3], 128  }
   0x9   :  { %180 = vsyncadd [#allocation3], 4294967168 }
   0xa   :  { %181 = dma.done.wait [#allocation6], 128  }
   0xb   :  { %182 = vsyncadd [#allocation6], 4294967168  ;;  %v187_v0 = vmov 0   ;;  %v56_v1 = vld [vmem:[%s235_s3] sm:$0xff]  ;;  %v48_v7 = vld [vmem:[#allocation5] sm:$0xff]  ;;  %v188_v10 = vmov 0.0  }
   0xc   :  { %106 = vset.pattern.permute.xlu0 %v187_v0  ;;  %vm57_vm0 = vcmp.eq.f32.partialorder %v56_v1, 0.0  ;;  %v46_v3 = vld [vmem:[%s232_s0] sm:$0xff]  ;;  %vm52_vm1 = vcmp.eq.f32.partialorder %v48_v7, 0.0  ;;  %vm53_vm2 = vcmp.eq.f32.partialorder %v48_v7, 0.25  ;;  %vm54_vm3 = vcmp.eq.f32.partialorder %v48_v7, 1.0  ;;  %s189_s0 = smov [#allocation7]  }
   0xd   :  { %v59_v2 = vsel %vm57_vm0, 1, %v187_v0  ;;  %v47_v4 = vld [vmem:[#allocation2] sm:$0xff]  ;;  %v49_v5 = vsub.f32 0.0, %v46_v3  ;;  %vm55_vm4 = vmor %vm53_vm2, %vm54_vm3  ;;  %v69_v11 = vsel %vm52_vm1, 1.0, %v188_v10  ;;  %vm58_vm5 = vcmp.lt.f32.partialorder %v46_v3, 0.0  ;;  %s83_s3 = sshll.u32 %s189_s0, 4  ;;  %s84_s3 = int_to_ptr.vmem [resolvable:$true] %s83_s3 }
   0xe   :  { %61 = vperm.xlu0 %106, %v59_v2   ;;  %v50_v6 = vsub.f32 %v46_v3, %v47_v4  ;;  %70 = vst [vmem:[#allocation7 + $0x10] sm:$0xff] %v69_v11  ;;  %v77_v14 = vsel %vm55_vm4, 1.0, %v188_v10  ;;  %s85_s29 = sshll.u32 %s236_s4, 4  ;;  %s190_s30 = smov 128   ;;  %s86_s29 = int_to_ptr.hbm [resolvable:$true] %s85_s29 }
   0xf   :  { %v66_v9 = vmax.f32 %v49_v5, 0.0  ;;  %78 = vst [vmem:[#allocation7 + $0x30] sm:$0xff] %v77_v14  ;;  %s191_s5 = smov 8  }
  0x10   :  { %v51_v8 = vmul.f32 %v50_v6, %v50_v6 }
  0x11   :  { %v67_v12 = vsel %vm52_vm1, %v66_v9, 0.0 }
  0x12   :  { %65 = vst [vmem:[#allocation7] sm:$0xff] %v51_v8  ;;  %v75_v13 = vsel %vm55_vm4, %v51_v8, 0.0 }
  0x13   :  { %68 = vst [vmem:[#allocation7 + $0x8] sm:$0xff] %v67_v12 }
  0x14   :  { %76 = vst [vmem:[#allocation7 + $0x28] sm:$0xff] %v75_v13 }
  0x80   :  { %v62_v15 = vpop.permute.xlu0 %61 }
  0x81   :  { %vm63_vm6 = vcmp.eq.s32.totalorder %v62_v15, 1 }
  0x82   :  { %vm64_vm7 = vmand %vm63_vm6, %vm58_vm5 }
  0x83   :  { %v71_v16 = vsel %vm64_vm7, %v49_v5, 0.0  ;;  %v73_v17 = vsel %vm64_vm7, 1.0, %v188_v10 }
  0x84   :  { %72 = vst [vmem:[#allocation7 + $0x18] sm:$0xff] %v71_v16 }
  0x85   :  { %74 = vst [vmem:[#allocation7 + $0x20] sm:$0xff] %v73_v17 }
  0x86   :  { %91 = dma.vmem_to_hbm [thread:$0]  %s84_s3, 896, %s86_s29, [#allocation4], %s190_s30, %s190_s30, %s191_s5  }
  0x87   :  { %183 = dma.done.wait [#allocation4], 896  }
  0x88   :  { %184 = vsyncadd [#allocation4], 4294966400 }
  0x89   :  { %96 = vsyncpa [#allocation3], 1 }
  0x8a   :  { %97 = vsyncpa [#allocation6], 1 }
  0x8b   :  { %98 = vsyncpa [#allocation4], 1 }

</bundles_post_ra>
